<compile_context>
chip_gen: v7x
topology: tpu7x:2x2x1
jax: 0.10.0
libtpu: 0.0.40
codegen_flags: <defaults>
</compile_context>

<pallas_src>
import jax
import jax.numpy as jnp
from jax.experimental import pallas as pl


def _bnn_kernel(x_ref, w1_ref, b1_ref, w2_ref, b2_ref, mask_ref, o_ref):
    # ---- shared hidden layer (computed once for all n_eval MC passes) -------
    # (B, D_in) @ (D_in, H) on the MXU, f32 accumulation.
    h = jnp.dot(x_ref[...], w1_ref[...], preferred_element_type=jnp.float32)
    h = jnp.maximum(h + b1_ref[...], 0.0)                    # (B, H) ReLU

    # ---- fold the output weight row into the activations once (VPU) --------
    # w2_ref is the transposed output weight, shape (1, H).
    hw = h * w2_ref[...]                                      # (B, H)

    # ---- per-eval dropout + "Linear(H, 1)" as a lane reduction --------------
    # out[e, b] = sum_h mask[e, b, h] * h[b, h] * w2[h]  + b2
    # mask already carries the 1/keep_prob inverted-dropout scale.
    out = jnp.sum(mask_ref[...] * hw[None, :, :], axis=-1)    # (n_eval, B)
    o_ref[...] = (out + b2_ref[0, 0]).astype(o_ref.dtype)


def single_network_pointwise_bnn_eval(data, params, *, n_eval, seed,
                                      keep_prob=0.9, apply_dropout=True):
    """Eval-mode forward of SingleNetworkPointwiseBNN: n_eval passes, squeeze."""
    w1, b1, w2, b2 = params        # w1:(D_in,H) b1:(1,H) w2:(H,D_out) b2:(1,D_out)
    B, D_in = data.shape
    H = w1.shape[1]
    D_out = w2.shape[1]
    assert D_out == 1, "pointwise BNN body ends in Linear(H, 1)"

    # One bulk draw of dropout masks for all n_eval evaluations (inverted
    # dropout: kept units are scaled by 1/keep_prob).  keep_prob >= 1.0 or
    # apply_dropout=False -> identity mask (strict nn.Dropout eval semantics).
    if apply_dropout and float(keep_prob) < 1.0:
        keep = jax.random.bernoulli(jax.random.PRNGKey(seed),
                                    p=float(keep_prob), shape=(n_eval, B, H))
        mask = keep.astype(jnp.float32) * (1.0 / float(keep_prob))
    else:
        mask = jnp.ones((n_eval, B, H), jnp.float32)

    w2_row = jnp.transpose(w2)     # (1, H): lane-aligned row for the VPU path

    flops = 2 * B * D_in * H + B * H + 3 * n_eval * B * H
    bytes_accessed = 4 * (B * D_in + D_in * H + 2 * H + 1
                          + n_eval * B * H + n_eval * B)

    out = pl.pallas_call(
        _bnn_kernel,
        out_shape=jax.ShapeDtypeStruct((n_eval, B), jnp.float32),
        cost_estimate=pl.CostEstimate(flops=flops,
                                      transcendentals=0,
                                      bytes_accessed=bytes_accessed),
    )(data, w1, b1, w2_row, b2, mask)

    # torch .squeeze(): drop all size-1 dims (no-op for n_eval>1 and B>1).
    return jnp.squeeze(out)


def init_params(key, d_in, hidden, d_out):
    """Deterministic nn.Linear-style init, stored transposed as (in, out)."""
    k1, k2, k3, k4 = jax.random.split(key, 4)
    s1 = 1.0 / jnp.sqrt(d_in)
    s2 = 1.0 / jnp.sqrt(hidden)
    w1 = jax.random.uniform(k1, (d_in, hidden), jnp.float32, -s1, s1)
    b1 = jax.random.uniform(k2, (1, hidden), jnp.float32, -s1, s1)
    w2 = jax.random.uniform(k3, (hidden, d_out), jnp.float32, -s2, s2)
    b2 = jax.random.uniform(k4, (1, d_out), jnp.float32, -s2, s2)
    return w1, b1, w2, b2


if __name__ == "__main__":
    B, D_IN, HIDDEN, D_OUT, N_EVAL = 8, 32, 128, 1, 4

    key = jax.random.PRNGKey(0)
    k_data, k_params = jax.random.split(key)
    data = jax.random.normal(k_data, (B, D_IN), jnp.float32)
    params = init_params(k_params, D_IN, HIDDEN, D_OUT)

    # MC-dropout BNN forward (eval mode of the wrapper): n_eval stochastic passes.
    out = single_network_pointwise_bnn_eval(
        data, params, n_eval=N_EVAL, seed=1234, keep_prob=0.9, apply_dropout=True)
    out = jax.block_until_ready(out)
    assert out.shape == (N_EVAL, B), out.shape
    assert bool(jnp.all(jnp.isfinite(out)))

    # Sanity check: with the stochastic component disabled (strict nn.Dropout
    # eval semantics) every evaluation equals the plain-JAX reference.
    out_det = jax.block_until_ready(single_network_pointwise_bnn_eval(
        data, params, n_eval=N_EVAL, seed=0, apply_dropout=False))
    w1, b1, w2, b2 = params
    ref = (jnp.maximum(data @ w1 + b1, 0.0) @ w2 + b2)[:, 0]   # (B,)
    assert jnp.allclose(out_det, jnp.broadcast_to(ref, (N_EVAL, B)),
                        atol=1e-5, rtol=1e-5)

    # Also check the MC path's expectation is in the right ballpark (mean of
    # inverted dropout equals the deterministic output in expectation).
    assert jnp.all(jnp.abs(out.mean(0) - ref) < 10.0)

    print("KERNEL_OK")
</pallas_src>

<mosaic_0001>
module attributes {stable_mosaic.version = 11 : i64} {
  func.func @_bnn_kernel(%arg0: memref<8x32xf32, #tpu.memory_space<vmem>>, %arg1: memref<32x128xf32, #tpu.memory_space<vmem>>, %arg2: memref<1x128xf32, #tpu.memory_space<vmem>>, %arg3: memref<1x128xf32, #tpu.memory_space<vmem>>, %arg4: memref<1x1xf32, #tpu.memory_space<vmem>>, %arg5: memref<4x8x128xf32, #tpu.memory_space<vmem>>, %arg6: memref<4x8xf32, #tpu.memory_space<vmem>>) attributes {dimension_semantics = [], scalar_prefetch = 0 : i64, scratch_operands = 0 : i64, tpu.core_type = #tpu.core_type<tc>} {
    %c0 = arith.constant 0 : index
    %c0_0 = arith.constant 0 : index
    %0 = vector.load %arg0[%c0, %c0_0] : memref<8x32xf32, #tpu.memory_space<vmem>>, vector<8x32xf32>
    %c0_1 = arith.constant 0 : index
    %c0_2 = arith.constant 0 : index
    %1 = vector.load %arg1[%c0_1, %c0_2] : memref<32x128xf32, #tpu.memory_space<vmem>>, vector<32x128xf32>
    %cst = arith.constant dense<0.000000e+00> : vector<8x128xf32>
    %2 = tpu.matmul %0, %1, %cst {dimension_numbers = #tpu.dot_dimension_numbers<[1], [0], [0], [1], [0, 0, 1, 1], [], []>} : vector<8x32xf32>, vector<32x128xf32>, vector<8x128xf32> -> vector<8x128xf32>
    %c0_3 = arith.constant 0 : index
    %c0_4 = arith.constant 0 : index
    %3 = vector.load %arg2[%c0_3, %c0_4] : memref<1x128xf32, #tpu.memory_space<vmem>>, vector<1x128xf32>
    %4 = vector.broadcast %3 : vector<1x128xf32> to vector<8x128xf32>
    %5 = arith.addf %2, %4 : vector<8x128xf32>
    %cst_5 = arith.constant 0.000000e+00 : f32
    %6 = vector.broadcast %cst_5 : f32 to vector<8x128xf32>
    %7 = arith.maximumf %5, %6 : vector<8x128xf32>
    %c0_6 = arith.constant 0 : index
    %c0_7 = arith.constant 0 : index
    %8 = vector.load %arg3[%c0_6, %c0_7] : memref<1x128xf32, #tpu.memory_space<vmem>>, vector<1x128xf32>
    %9 = vector.broadcast %8 : vector<1x128xf32> to vector<8x128xf32>
    %10 = arith.mulf %7, %9 : vector<8x128xf32>
    %c0_8 = arith.constant 0 : index
    %c0_9 = arith.constant 0 : index
    %c0_10 = arith.constant 0 : index
    %11 = vector.load %arg5[%c0_8, %c0_9, %c0_10] : memref<4x8x128xf32, #tpu.memory_space<vmem>>, vector<4x8x128xf32>
    %12 = vector.shape_cast %10 : vector<8x128xf32> to vector<1x8x128xf32>
    %13 = vector.broadcast %12 : vector<1x8x128xf32> to vector<4x8x128xf32>
    %14 = arith.mulf %11, %13 : vector<4x8x128xf32>
    %cst_11 = arith.constant dense<0.000000e+00> : vector<4x8xf32>
    %15 = vector.multi_reduction <add>, %14, %cst_11 [2] : vector<4x8x128xf32> to vector<4x8xf32>
    %c0_12 = arith.constant 0 : index
    %c0_13 = arith.constant 0 : index
    %16 = vector.load %arg4[%c0_12, %c0_13] : memref<1x1xf32, #tpu.memory_space<vmem>>, vector<1x1xf32>
    %17 = vector.extract %16[0, 0] : f32 from vector<1x1xf32>
    %18 = vector.broadcast %17 : f32 to vector<4x8xf32>
    %19 = arith.addf %15, %18 : vector<4x8xf32>
    %c0_14 = arith.constant 0 : index
    %c0_15 = arith.constant 0 : index
    %20 = vector.load %arg6[%c0_14, %c0_15] : memref<4x8xf32, #tpu.memory_space<vmem>>, vector<4x8xf32>
    tpu.vector_store %arg6[%c0_14, %c0_15], %19 {strides = array<i32>} : memref<4x8xf32, #tpu.memory_space<vmem>>, vector<4x8xf32>,
    return
  }
}

</mosaic_0001>

<bundles_post_ra>
// kernel: tpu_custom_call.1
= control target key start
LH: loop header
LB: loop body
LE: loop exit
PB: predicated region body
PF: predicated region fallthrough
CT: control target
= control target key end

     0   :  { %s467_s0 = inlined_call_operand.hbm [shape: f32[8,32], index: 0, kind: input, shape index: {}]   ;;  %s468_s1 = inlined_call_operand.hbm [shape: f32[32,128], index: 1, kind: input, shape index: {}]   ;;  %s469_s2 = inlined_call_operand.vmem [shape: f32[1,128], index: 2, kind: input, shape index: {}]   ;;  %s470_s3 = inlined_call_operand.vmem [shape: f32[1,128], index: 3, kind: input, shape index: {}]   ;;  %s471_s4 = inlined_call_operand.<no memory space> [shape: f32[1,1], index: 4, kind: input, shape index: {}]   ;;  %s472_s5 = inlined_call_operand.hbm [shape: f32[4,8,128], index: 5, kind: input, shape index: {}]   ;;  %s473_s6 = inlined_call_operand.hbm [shape: f32[4,8], index: 6, kind: output, shape index: {}]  }
   0x1   :  { %v11_v0 = vstv %s471_s4 }
   0x2   :  { %12 = vst [vmem:[#allocation2] sm:$0x1] %v11_v0 }
   0x3   :  { %13 = vsyncpa [#allocation4], 0 }
   0x4   :  { %14 = vsyncpa [#allocation7], 0 }
   0x5   :  { %15 = vsyncpa [#allocation5], 0  ;;  %s360_s23 = smov [#allocation6]   ;;  %s266_s27 = scalar_lea.hbm %s468_s1, 512 }
   0x6   :  { %s31_s24 = sshll.u32 %s360_s23, 4  ;;  %p267_p0 = scmp.ne.s32.totalorder %s468_s1, %s266_s27  ;;  %s32_s24 = int_to_ptr.vmem [resolvable:$true] %s31_s24 }
   0x7   :  { %p270_p1 = scmp.lt.u32.totalorder %s266_s27, %s468_s1 }
   0x9   :  { %p272_p2 = pnand %p270_p1, %p267_p0 }
   0xb   :  { %275 = shalt.err (!%p272_p2)
}
   0xc   :  { %s276_s4 = scalar_lea.vmem %s32_s24, 512  ;;  %p281_p4 = scmp.lt.s32.totalorder %s32_s24, %s32_s24 }
   0xd   :  { %p277_p3 = scmp.ne.s32.totalorder %s32_s24, %s276_s4  ;;  %p282_p5 = scmp.lt.s32.totalorder %s276_s4, %s276_s4 }
   0xf   :  { %p283_p6 = por %p282_p5, %p281_p4 }
  0x11   :  { %p284_p7 = pnand %p283_p6, %p277_p3 }
  0x13   :  { %287 = shalt.err (!%p284_p7)
}
  0x14   :  { %s361_s8 = smov 128   ;;  %s362_s9 = smov 8  }
  0x15   :  { %37 = dma.hbm_to_vmem [thread:$0]  %s468_s1, 512, %s32_s24, [#allocation7], %s361_s8, %s361_s8, %s362_s9  }
  0x16   :  { %s363_s12 = smov [#allocation3]   ;;  %s364_s14 = smov [#allocation8]  }
  0x17   :  { %s22_s13 = sshll.u32 %s363_s12, 4  ;;  %s49_s15 = sshll.u32 %s364_s14, 4  ;;  %s23_s13 = int_to_ptr.vmem [resolvable:$true] %s22_s13  ;;  %s50_s15 = int_to_ptr.vmem [resolvable:$true] %s49_s15 }
  0x18   :  { %s288_s18 = scalar_lea.hbm %s467_s0, 128 }
  0x19   :  { %p289_p8 = scmp.ne.s32.totalorder %s467_s0, %s288_s18  ;;  %p292_p9 = scmp.lt.u32.totalorder %s288_s18, %s467_s0 }
  0x1b   :  { %p294_p10 = pnand %p292_p9, %p289_p8 }
  0x1d   :  { %297 = shalt.err (!%p294_p10)
}
  0x1e   :  { %s298_s1 = scalar_lea.vmem %s23_s13, 128  ;;  %p303_p12 = scmp.lt.s32.totalorder %s23_s13, %s23_s13 }
  0x1f   :  { %p299_p11 = scmp.ne.s32.totalorder %s23_s13, %s298_s1  ;;  %p304_p13 = scmp.lt.s32.totalorder %s298_s1, %s298_s1 }
  0x21   :  { %p305_p0 = por %p304_p13, %p303_p12 }
  0x23   :  { %p306_p1 = pnand %p305_p0, %p299_p11 }
  0x25   :  { %309 = shalt.err (!%p306_p1)
}
  0x26   :  { %25 = dma.hbm_to_vmem [thread:$0]  %s467_s0, 128, %s23_s13, [#allocation4]  }
  0x27   :  { %s310_s27 = scalar_lea.hbm %s472_s5, 512 }
  0x28   :  { %p311_p2 = scmp.ne.s32.totalorder %s472_s5, %s310_s27  ;;  %p314_p3 = scmp.lt.u32.totalorder %s310_s27, %s472_s5 }
  0x2a   :  { %p316_p4 = pnand %p314_p3, %p311_p2 }
  0x2c   :  { %319 = shalt.err (!%p316_p4)
}
  0x2d   :  { %s320_s4 = scalar_lea.vmem %s50_s15, 512  ;;  %p325_p6 = scmp.lt.s32.totalorder %s50_s15, %s50_s15 }
  0x2e   :  { %p321_p5 = scmp.ne.s32.totalorder %s50_s15, %s320_s4  ;;  %p326_p7 = scmp.lt.s32.totalorder %s320_s4, %s320_s4 }
  0x30   :  { %p327_p8 = por %p326_p7, %p325_p6 }
  0x32   :  { %p328_p9 = pnand %p327_p8, %p321_p5 }
  0x34   :  { %331 = shalt.err (!%p328_p9)
}
  0x35   :  { %55 = dma.hbm_to_vmem [thread:$0]  %s472_s5, 512, %s50_s15, [#allocation7], %s361_s8, %s361_s8, %s362_s9  }
  0x36   :  { %354 = dma.done.wait [#allocation4], 128  }
  0x37   :  { %355 = vsyncadd [#allocation4], 4294967168 }
  0x38   :  { %356 = dma.done.wait [#allocation7], 1024  }
  0x39   :  { %357 = vsyncadd [#allocation7], 4294966272  ;;  %v365_v1 = vmov 0.0|0.0   ;;  %vm366_vm0 = vmmov 0   ;;  %v367_v2 = vmov 0.0   ;;  %v66_v3 = vld [vmem:[#allocation6] sm:$0xff]  ;;  %v187_v26 = vlaneseq }
  0x3a   :  { %249 = vmatprep.subr.bf16.mxu0 %v365_v1  ;;  %246 = vmatprep.mubr.msk.f32.mxu0 %vm366_vm0, %v367_v2  ;;  %v67_v4 = vld [vmem:[#allocation6 + $0x8] sm:$0xff]  ;;  %v68_v5 = vld [vmem:[#allocation6 + $0x10] sm:$0xff]  ;;  %v69_v7 = vld [vmem:[#allocation6 + $0x18] sm:$0xff]  ;;  %vm77_vm1 = vcmask 261120   ;;  %vm205_vm2 = vcmask 1041409   ;;  %vm207_vm3 = vcmask 1042434  }
  0x3b   :  { %v250_v6 = vpack.c.bf16 %v67_v4, %v66_v3  ;;  %v253_v8 = vpack.c.bf16 %v69_v7, %v68_v5  ;;  %v65_v9 = vld [vmem:[#allocation3] sm:$0xff]  ;;  %v176_v10 = vld [vmem:[#allocation2] sm:$0x1]  ;;  %v160_v18 = vld [vmem:[#allocation8] sm:$0xff]  ;;  %v188_v27 = vand.u32 127, %v187_v26  ;;  %v190_v28 = vshrl.u32 %v187_v26, 7 }
  0x3c   :  { %255 = vpush %v176_v10  ;;  %v230_v11 = vld [vmem:[%s469_s2] ss:$0 sm:$0xff]  ;;  %v163_v22 = vld [vmem:[#allocation8 + $0x18] sm:$0xff]  ;;  %v161_v23 = vld [vmem:[#allocation8 + $0x8] sm:$0xff]  ;;  %vm209_vm4 = vcmask 1043459   ;;  %vm212_vm5 = vcmask 60416  }
  0x3d   :  { %251 = vmatpush3.bf16.msra.mxu0 %v250_v6  ;;  %v232_v15 = vld [vmem:[%s470_s3] ss:$0 sm:$0xff]  ;;  %v191_v32 = vsub.s32 %v188_v27, %v190_v28  ;;  %s368_s3 = smov [#allocation9]  }
  0x3e   :  { %252 = vmatprep.subr.bf16.mxu0 %v365_v1  ;;  %v162_v17 = vld [vmem:[#allocation8 + $0x10] sm:$0xff]  ;;  %s220_s12 = sshll.u32 %s368_s3, 4  ;;  %s221_s12 = int_to_ptr.vmem [resolvable:$true] %s220_s12 }
  0x3f   :  { %s332_s13 = scalar_lea.vmem %s221_s12, 64  ;;  %p337_p11 = scmp.lt.s32.totalorder %s221_s12, %s221_s12 }
  0x40   :  { %p333_p10 = scmp.ne.s32.totalorder %s221_s12, %s332_s13  ;;  %p338_p12 = scmp.lt.s32.totalorder %s332_s13, %s332_s13 }
  0x41   :  { %254 = vmatpush3.bf16.msra.mxu0 %v253_v8 }
  0x42   :  { %p339_p13 = por %p338_p12, %p337_p11 }
  0x44   :  { %247 = vmatmul.mubr.msk.f32.vlgmr.msra.gmra.mrb[0].mxu0 %vm77_vm1, %v65_v9  ;;  %p340_p0 = pnand %p339_p13, %p333_p10 }
  0x6d   :  { %s256_s2 = spop %255 }
  0x6e   :  { %v178_v29 = vstv %s256_s2 }
 0x117   :  { %v147_v12 = vpop.f32.mrb[0].mxu0 }
 0x118   :  { %v148_v13 = vadd.f32 %v230_v11, %v147_v12  ;;  %v248_v14 = vpop.f32.mrb[1].mxu0 }
 0x11a   :  { %v151_v16 = vmax.f32 %v148_v13, 0.0 }
 0x11c   :  { %v159_v19 = vmul.f32 %v232_v15, %v151_v16 }
 0x11e   :  { %v166_v20 = vmul.f32 %v162_v17, %v159_v19  ;;  %v164_v21 = vmul.f32 %v160_v18, %v159_v19  ;;  %v167_v24 = vmul.f32 %v163_v22, %v159_v19  ;;  %v165_v25 = vmul.f32 %v161_v23, %v159_v19 }
 0x120   :  { %172 = vadd.xlane.f32.xlu1 %v166_v20  ;;  %168 = vadd.xlane.f32.xlu0 %v164_v21 }
 0x124   :  { %174 = vadd.xlane.f32.xlu1 %v167_v24  ;;  %170 = vadd.xlane.f32.xlu0 %v165_v25 }
 0x1ad   :  { %v173_v30 = vpop.xlane.xlu1 %172  ;;  %v169_v31 = vpop.xlane.xlu0 %168 }
 0x1ae   :  { %v179_v33 = vadd.f32 %v178_v29, %v169_v31  ;;  %v181_v34 = vadd.f32 %v178_v29, %v173_v30 }
 0x1b0   :  { %v192_v39 = vrot.slane %v179_v33, %v191_v32  ;;  %v200_v41 = vrot.slane %v181_v34, %v191_v32 }
 0x1b1   :  { %v175_v35 = vpop.xlane.xlu1 %174  ;;  %v171_v36 = vpop.xlane.xlu0 %170 }
 0x1b2   :  { %v182_v37 = vadd.f32 %v178_v29, %v175_v35  ;;  %v180_v38 = vadd.f32 %v178_v29, %v171_v36 }
 0x1b4   :  { %v196_v40 = vrot.slane %v180_v38, %v191_v32  ;;  %v204_v42 = vrot.slane %v182_v37, %v191_v32 }
 0x1b6   :  { %v206_v43 = vsel %vm205_vm2, %v196_v40, %v192_v39 }
 0x1b7   :  { %v208_v44 = vsel %vm207_vm3, %v200_v41, %v206_v43 }
 0x1b8   :  { %v210_v45 = vsel %vm209_vm4, %v204_v42, %v208_v44 }
 0x1b9   :  { %213 = vst.msk [vmem:[#allocation9] sm:$0xf] %vm212_vm5, %v210_v45 }
 0x1ba   :  { %343 = shalt.err (!%p340_p0)
}
 0x1bb   :  { %s344_s16 = scalar_lea.hbm %s473_s6, 64 }
 0x1bc   :  { %p345_p1 = scmp.ne.s32.totalorder %s473_s6, %s344_s16  ;;  %p348_p2 = scmp.lt.u32.totalorder %s344_s16, %s473_s6 }
 0x1be   :  { %p350_p3 = pnand %p348_p2, %p345_p1 }
 0x1c0   :  { %353 = shalt.err (!%p350_p3)
}
 0x1c1   :  { %223 = dma.vmem_to_hbm [thread:$0]  %s221_s12, 64, %s473_s6, [#allocation5]  }
 0x1c2   :  { %358 = dma.done.wait [#allocation5], 64  }
 0x1c3   :  { %359 = vsyncadd [#allocation5], 4294967232 }
 0x1c4   :  { %227 = vsyncpa [#allocation4], 1 }
 0x1c5   :  { %228 = vsyncpa [#allocation7], 1 }
 0x1c6   :  { %229 = vsyncpa [#allocation5], 1 }

</bundles_post_ra>
